<compile_context>
chip_gen: v7x
topology: tpu7x:2x2x1
jax: 0.10.0
libtpu: 0.0.40
codegen_flags: <defaults>
</compile_context>

<pallas_src>
import math

import jax
import jax.numpy as jnp
from jax.experimental import pallas as pl
from jax.experimental.pallas import tpu as pltpu


def mha_kernel(xq_ref, xkv_ref, wq_ref, bq_ref, wk_ref, bk_ref, wv_ref, bv_ref,
               wf_ref, bf_ref, o_ref, acc_ref):
    h = pl.program_id(2)                      # head axis = reduction (innermost)

    @pl.when(h == 0)
    def _init():
        acc_ref[...] = jnp.zeros_like(acc_ref)

    xq = xq_ref[0]                            # (tq, H) bf16 — query rows for this tile
    xkv = xkv_ref[0]                          # (S,  H) bf16 — full sequence (keys/values)

    # Per-head projections: plain 2-D MXU matmuls with f32 accumulation.
    # (1/sqrt(head_dim) is already folded into wq/bq on the host.)
    q = jnp.dot(xq, wq_ref[0], preferred_element_type=jnp.float32) + bq_ref[0]    # (tq, hd)
    k = jnp.dot(xkv, wk_ref[0], preferred_element_type=jnp.float32) + bk_ref[0]   # (S,  hd)
    v = jnp.dot(xkv, wv_ref[0], preferred_element_type=jnp.float32) + bv_ref[0]   # (S,  hd)

    # scores[q, k] = <q_row, k_row>  (contract head_dim; transposed-operand MXU path)
    scores = jnp.einsum('qd,kd->qk', q.astype(jnp.bfloat16), k.astype(jnp.bfloat16),
                        preferred_element_type=jnp.float32)                        # (tq, S)

    # Softmax in f32 (v5e has no bf16 VPU/EUP); divide via EUP approx reciprocal.
    m = jnp.max(scores, axis=-1, keepdims=True)
    e = jnp.exp(scores - m)
    probs = e * pl.reciprocal(jnp.sum(e, axis=-1, keepdims=True), approx=True)

    attn = jnp.dot(probs.astype(jnp.bfloat16), v.astype(jnp.bfloat16),
                   preferred_element_type=jnp.float32)                             # (tq, hd)

    # Head-merge + output projection fused into an accumulation over heads:
    #   out = sum_h attn_h @ Wf_h   (no concat, no (S,H) f32 materialisation)
    acc_ref[...] += jnp.dot(attn.astype(jnp.bfloat16), wf_ref[0],
                            preferred_element_type=jnp.float32)                    # (tq, H)

    @pl.when(h == pl.num_programs(2) - 1)
    def _finalize():
        o_ref[0] = (acc_ref[...] + bf_ref[...]).astype(o_ref.dtype)


def _pick_query_tile(seq_len):
    # Monolithic query block for short sequences; for longer sequences tile the
    # query axis (multiples of 256 keep the v6e/v7x 256-wide MXU full) so the
    # per-step score block stays bounded and both v7x TensorCores get work.
    if seq_len <= 1024:
        return seq_len
    for t in (1024, 512, 256):
        if seq_len % t == 0:
            return t
    return seq_len


def _vmem_estimate(seq_len, hidden_dim, head_dim, q_tile):
    bf16, f32 = 2, 4
    S, H, hd, tq = seq_len, hidden_dim, head_dim, q_tile
    # Pipeline blocks are double-buffered by default.
    blocks = 2 * (
        tq * H * bf16            # xq block
        + S * H * bf16           # xkv block
        + 3 * H * hd * bf16      # per-head wq / wk / wv blocks
        + 3 * hd * f32           # per-head bq / bk / bv blocks
        + hd * H * bf16          # per-head wf block
        + H * f32                # fc bias
        + tq * H * f32           # output block
    )
    intermediates = (
        (tq + 2 * S) * hd * (f32 + bf16)   # q / k / v (f32) + bf16 casts
        + tq * S * (2 * f32 + bf16)        # scores, exp/probs, bf16 probs
        + tq * hd * (f32 + bf16)           # attn + bf16 cast
        + tq * H * f32                     # accumulator scratch
    )
    return blocks + intermediates


def multi_head_attention(x, params, num_heads):
    # x: (B, S, H)
    B, S, H = x.shape
    head_dim = H // num_heads
    wq, bq, wk, bk, wv, bv, wf, bf = params
    scale = 1.0 / math.sqrt(float(head_dim))

    tq = _pick_query_tile(S)
    num_q_tiles = S // tq

    # Host-side (XLA) prep — done once, outside the kernel:
    #  * pre-transpose so the kernel contracts in natural layout (no in-kernel .T)
    #  * split every weight per head — (nh, H, hd) for Q/K/V, (nh, hd, H) for fc —
    #    so the head split / merge needs zero in-kernel data movement
    #  * fold the attention scale into Q; cast MXU operands to bf16, biases f32
    def per_head_in(w):                      # nn.Linear weight (out, in) -> (nh, H, hd)
        return jnp.transpose(w.T.reshape(H, num_heads, head_dim), (1, 0, 2))

    wq_h = per_head_in(wq * scale).astype(jnp.bfloat16)                       # (nh, H, hd)
    wk_h = per_head_in(wk).astype(jnp.bfloat16)                               # (nh, H, hd)
    wv_h = per_head_in(wv).astype(jnp.bfloat16)                               # (nh, H, hd)
    bq_h = (bq * scale).reshape(num_heads, 1, head_dim).astype(jnp.float32)   # (nh, 1, hd)
    bk_h = bk.reshape(num_heads, 1, head_dim).astype(jnp.float32)
    bv_h = bv.reshape(num_heads, 1, head_dim).astype(jnp.float32)
    wf_h = wf.T.reshape(num_heads, head_dim, H).astype(jnp.bfloat16)          # (nh, hd, H)
    bf2 = bf.reshape(1, H).astype(jnp.float32)                                # (1, H)
    x_bf = x.astype(jnp.bfloat16)

    # VMEM budget including in-kernel intermediates, capped under physical VMEM
    # minus headroom for compiler scratch (64 MiB on v7x, 128 MiB on v5e/v6e).
    est = _vmem_estimate(S, H, head_dim, tq) + (4 << 20)
    try:
        phys = int(pltpu.get_tpu_info().vmem_capacity_bytes)
    except Exception:
        phys = 64 << 20
    cap = max(32 << 20, phys - (16 << 20))
    vmem_limit = int(min(cap, max(32 << 20, est)))

    head_blk = lambda b, qi, h: (h, 0, 0)     # per-head weight / bias blocks
    const = lambda b, qi, h: (0, 0)           # grid-invariant fc bias

    return pl.pallas_call(
        mha_kernel,
        out_shape=jax.ShapeDtypeStruct((B, S, H), x.dtype),
        grid_spec=pltpu.PrefetchScalarGridSpec(
            num_scalar_prefetch=0,
            grid=(B, num_q_tiles, num_heads),
            in_specs=[
                pl.BlockSpec((1, tq, H), lambda b, qi, h: (b, qi, 0)),     # x (query rows)
                pl.BlockSpec((1, S, H), lambda b, qi, h: (b, 0, 0)),       # x (key/value rows)
                pl.BlockSpec((1, H, head_dim), head_blk),                  # wq   (head h)
                pl.BlockSpec((1, 1, head_dim), head_blk),                  # bq
                pl.BlockSpec((1, H, head_dim), head_blk),                  # wk
                pl.BlockSpec((1, 1, head_dim), head_blk),                  # bk
                pl.BlockSpec((1, H, head_dim), head_blk),                  # wv
                pl.BlockSpec((1, 1, head_dim), head_blk),                  # bv
                pl.BlockSpec((1, head_dim, H), head_blk),                  # wf   (head h)
                pl.BlockSpec((1, H), const),                               # fc bias
            ],
            out_specs=pl.BlockSpec((1, tq, H), lambda b, qi, h: (b, qi, 0)),
            scratch_shapes=[pltpu.VMEM((tq, H), jnp.float32)],             # per-tile accumulator
        ),
        compiler_params=pltpu.CompilerParams(
            dimension_semantics=("parallel", "parallel", "arbitrary"),
            vmem_limit_bytes=vmem_limit,
        ),
    )(x_bf, x_bf, wq_h, bq_h, wk_h, bk_h, wv_h, bv_h, wf_h, bf2)


def init_params(key, hidden_dim):
    # Deterministic init mimicking nn.Linear default: U(-1/sqrt(in), 1/sqrt(in))
    bound = 1.0 / math.sqrt(hidden_dim)
    keys = jax.random.split(key, 8)
    wq = jax.random.uniform(keys[0], (hidden_dim, hidden_dim), jnp.float32, -bound, bound)
    bq = jax.random.uniform(keys[1], (hidden_dim,), jnp.float32, -bound, bound)
    wk = jax.random.uniform(keys[2], (hidden_dim, hidden_dim), jnp.float32, -bound, bound)
    bk = jax.random.uniform(keys[3], (hidden_dim,), jnp.float32, -bound, bound)
    wv = jax.random.uniform(keys[4], (hidden_dim, hidden_dim), jnp.float32, -bound, bound)
    bv = jax.random.uniform(keys[5], (hidden_dim,), jnp.float32, -bound, bound)
    wf = jax.random.uniform(keys[6], (hidden_dim, hidden_dim), jnp.float32, -bound, bound)
    bf = jax.random.uniform(keys[7], (hidden_dim,), jnp.float32, -bound, bound)
    return (wq, bq, wk, bk, wv, bv, wf, bf)


def mha_reference(x, params, num_heads):
    # Pure-JAX f32 reference mirroring the PyTorch forward exactly.
    wq, bq, wk, bk, wv, bv, wf, bf = params
    B, S, H = x.shape
    hd = H // num_heads
    q = (x @ wq.T + bq).reshape(B, S, num_heads, hd).transpose(0, 2, 1, 3)
    k = (x @ wk.T + bk).reshape(B, S, num_heads, hd).transpose(0, 2, 1, 3)
    v = (x @ wv.T + bv).reshape(B, S, num_heads, hd).transpose(0, 2, 1, 3)
    scores = jnp.einsum("bhqd,bhkd->bhqk", q, k) / jnp.sqrt(jnp.float32(hd))
    probs = jax.nn.softmax(scores, axis=-1)
    attn = jnp.einsum("bhqk,bhkd->bhqd", probs, v)
    attn = attn.transpose(0, 2, 1, 3).reshape(B, S, H)
    return attn @ wf.T + bf


if __name__ == "__main__":
    B, S, H, NH = 2, 8, 32, 4
    key = jax.random.PRNGKey(0)
    kx, kp = jax.random.split(key)
    x = jax.random.normal(kx, (B, S, H), dtype=jnp.float32)
    params = init_params(kp, H)

    out = multi_head_attention(x, params, NH)
    out = jax.block_until_ready(out)

    ref = mha_reference(x, params, NH)
    assert out.shape == (B, S, H)
    # bf16 MXU inputs + approx reciprocal -> loose-but-meaningful tolerance vs f32 ref.
    assert jnp.allclose(out, ref, atol=5e-2, rtol=5e-2), "mismatch vs reference"

    print("KERNEL_OK")
</pallas_src>

<mosaic_0001>
module attributes {stable_mosaic.version = 11 : i64} {
  func.func @mha_kernel(%arg0: i32, %arg1: i32, %arg2: i32, %arg3: memref<1x8x32xbf16, #tpu.memory_space<vmem>>, %arg4: memref<1x8x32xbf16, #tpu.memory_space<vmem>>, %arg5: memref<1x32x8xbf16, #tpu.memory_space<vmem>>, %arg6: memref<1x1x8xf32, #tpu.memory_space<vmem>>, %arg7: memref<1x32x8xbf16, #tpu.memory_space<vmem>>, %arg8: memref<1x1x8xf32, #tpu.memory_space<vmem>>, %arg9: memref<1x32x8xbf16, #tpu.memory_space<vmem>>, %arg10: memref<1x1x8xf32, #tpu.memory_space<vmem>>, %arg11: memref<1x8x32xbf16, #tpu.memory_space<vmem>>, %arg12: memref<1x32xf32, #tpu.memory_space<vmem>>, %arg13: memref<1x8x32xf32, #tpu.memory_space<vmem>>, %arg14: memref<8x32xf32, #tpu.memory_space<vmem>>) attributes {dimension_semantics = [#tpu.dimension_semantics<parallel>, #tpu.dimension_semantics<parallel>, #tpu.dimension_semantics<arbitrary>], iteration_bounds = array<i64: 2, 1, 4>, scalar_prefetch = 0 : i64, scratch_operands = 1 : i64, tpu.core_type = #tpu.core_type<tc>, window_params = [{transform_indices = @transform_0, window_bounds = array<i64: 1, 8, 32>}, {transform_indices = @transform_1, window_bounds = array<i64: 1, 8, 32>}, {transform_indices = @transform_2, window_bounds = array<i64: 1, 32, 8>}, {transform_indices = @transform_3, window_bounds = array<i64: 1, 1, 8>}, {transform_indices = @transform_4, window_bounds = array<i64: 1, 32, 8>}, {transform_indices = @transform_5, window_bounds = array<i64: 1, 1, 8>}, {transform_indices = @transform_6, window_bounds = array<i64: 1, 32, 8>}, {transform_indices = @transform_7, window_bounds = array<i64: 1, 1, 8>}, {transform_indices = @transform_8, window_bounds = array<i64: 1, 8, 32>}, {pipeline_mode = #tpu.pipeline_mode<synchronous>, transform_indices = @transform_9, window_bounds = array<i64: 1, 32>}, {transform_indices = @transform_10, window_bounds = array<i64: 1, 8, 32>}]} {
    %c0_i32 = arith.constant 0 : i32
    %0 = arith.cmpi eq, %arg2, %c0_i32 : i32
    %1 = arith.extui %0 : i1 to i32
    %c0_i32_0 = arith.constant 0 : i32
    %2 = arith.cmpi ne, %1, %c0_i32_0 : i32
    scf.if %2 {
      %cst_39 = arith.constant 0.000000e+00 : f32
      %54 = vector.broadcast %cst_39 : f32 to vector<8x32xf32>
      %c0_40 = arith.constant 0 : index
      %c0_41 = arith.constant 0 : index
      %55 = vector.load %arg14[%c0_40, %c0_41] : memref<8x32xf32, #tpu.memory_space<vmem>>, vector<8x32xf32>
      tpu.vector_store %arg14[%c0_40, %c0_41], %54 {strides = array<i32>} : memref<8x32xf32, #tpu.memory_space<vmem>>, vector<8x32xf32>,
    } else {
    }
    %c0 = arith.constant 0 : index
    %c0_1 = arith.constant 0 : index
    %c0_2 = arith.constant 0 : index
    %3 = vector.load %arg3[%c0, %c0_1, %c0_2] : memref<1x8x32xbf16, #tpu.memory_space<vmem>>, vector<1x8x32xbf16>
    %4 = vector.shape_cast %3 : vector<1x8x32xbf16> to vector<8x32xbf16>
    %c0_3 = arith.constant 0 : index
    %c0_4 = arith.constant 0 : index
    %c0_5 = arith.constant 0 : index
    %5 = vector.load %arg4[%c0_3, %c0_4, %c0_5] : memref<1x8x32xbf16, #tpu.memory_space<vmem>>, vector<1x8x32xbf16>
    %6 = vector.shape_cast %5 : vector<1x8x32xbf16> to vector<8x32xbf16>
    %c0_6 = arith.constant 0 : index
    %c0_7 = arith.constant 0 : index
    %c0_8 = arith.constant 0 : index
    %7 = vector.load %arg5[%c0_6, %c0_7, %c0_8] : memref<1x32x8xbf16, #tpu.memory_space<vmem>>, vector<1x32x8xbf16>
    %8 = vector.shape_cast %7 : vector<1x32x8xbf16> to vector<32x8xbf16>
    %cst = arith.constant dense<0.000000e+00> : vector<8x8xf32>
    %9 = tpu.matmul %4, %8, %cst {dimension_numbers = #tpu.dot_dimension_numbers<[1], [0], [0], [1], [0, 0, 1, 1], [], []>} : vector<8x32xbf16>, vector<32x8xbf16>, vector<8x8xf32> -> vector<8x8xf32>
    %c0_9 = arith.constant 0 : index
    %c0_10 = arith.constant 0 : index
    %c0_11 = arith.constant 0 : index
    %10 = vector.load %arg6[%c0_9, %c0_10, %c0_11] : memref<1x1x8xf32, #tpu.memory_space<vmem>>, vector<1x1x8xf32>
    %11 = vector.shape_cast %10 : vector<1x1x8xf32> to vector<1x8xf32>
    %12 = vector.broadcast %11 : vector<1x8xf32> to vector<8x8xf32>
    %13 = arith.addf %9, %12 : vector<8x8xf32>
    %c0_12 = arith.constant 0 : index
    %c0_13 = arith.constant 0 : index
    %c0_14 = arith.constant 0 : index
    %14 = vector.load %arg7[%c0_12, %c0_13, %c0_14] : memref<1x32x8xbf16, #tpu.memory_space<vmem>>, vector<1x32x8xbf16>
    %15 = vector.shape_cast %14 : vector<1x32x8xbf16> to vector<32x8xbf16>
    %cst_15 = arith.constant dense<0.000000e+00> : vector<8x8xf32>
    %16 = tpu.matmul %6, %15, %cst_15 {dimension_numbers = #tpu.dot_dimension_numbers<[1], [0], [0], [1], [0, 0, 1, 1], [], []>} : vector<8x32xbf16>, vector<32x8xbf16>, vector<8x8xf32> -> vector<8x8xf32>
    %c0_16 = arith.constant 0 : index
    %c0_17 = arith.constant 0 : index
    %c0_18 = arith.constant 0 : index
    %17 = vector.load %arg8[%c0_16, %c0_17, %c0_18] : memref<1x1x8xf32, #tpu.memory_space<vmem>>, vector<1x1x8xf32>
    %18 = vector.shape_cast %17 : vector<1x1x8xf32> to vector<1x8xf32>
    %19 = vector.broadcast %18 : vector<1x8xf32> to vector<8x8xf32>
    %20 = arith.addf %16, %19 : vector<8x8xf32>
    %c0_19 = arith.constant 0 : index
    %c0_20 = arith.constant 0 : index
    %c0_21 = arith.constant 0 : index
    %21 = vector.load %arg9[%c0_19, %c0_20, %c0_21] : memref<1x32x8xbf16, #tpu.memory_space<vmem>>, vector<1x32x8xbf16>
    %22 = vector.shape_cast %21 : vector<1x32x8xbf16> to vector<32x8xbf16>
    %cst_22 = arith.constant dense<0.000000e+00> : vector<8x8xf32>
    %23 = tpu.matmul %6, %22, %cst_22 {dimension_numbers = #tpu.dot_dimension_numbers<[1], [0], [0], [1], [0, 0, 1, 1], [], []>} : vector<8x32xbf16>, vector<32x8xbf16>, vector<8x8xf32> -> vector<8x8xf32>
    %c0_23 = arith.constant 0 : index
    %c0_24 = arith.constant 0 : index
    %c0_25 = arith.constant 0 : index
    %24 = vector.load %arg10[%c0_23, %c0_24, %c0_25] : memref<1x1x8xf32, #tpu.memory_space<vmem>>, vector<1x1x8xf32>
    %25 = vector.shape_cast %24 : vector<1x1x8xf32> to vector<1x8xf32>
    %26 = vector.broadcast %25 : vector<1x8xf32> to vector<8x8xf32>
    %27 = arith.addf %23, %26 : vector<8x8xf32>
    %28 = arith.truncf %13 : vector<8x8xf32> to vector<8x8xbf16>
    %29 = arith.truncf %20 : vector<8x8xf32> to vector<8x8xbf16>
    "tpu.trace_start"() <{level = 10 : i32, message = "qd,kd->qk"}> : () -> ()
    %cst_26 = arith.constant dense<0.000000e+00> : vector<8x8xf32>
    %30 = tpu.matmul %28, %29, %cst_26 {dimension_numbers = #tpu.dot_dimension_numbers<[1], [1], [0], [0], [0, 0, 1, 0], [], []>} : vector<8x8xbf16>, vector<8x8xbf16>, vector<8x8xf32> -> vector<8x8xf32>
    "tpu.trace_stop"() : () -> ()
    %cst_27 = arith.constant dense<0xFF800000> : vector<8xf32>
    %31 = vector.multi_reduction <maximumf>, %30, %cst_27 [1] : vector<8x8xf32> to vector<8xf32>
    %32 = vector.shape_cast %31 : vector<8xf32> to vector<8x1xf32>
    %33 = vector.broadcast %32 : vector<8x1xf32> to vector<8x8xf32>
    %34 = arith.subf %30, %33 : vector<8x8xf32>
    %35 = math.exp %34 : vector<8x8xf32>
    %cst_28 = arith.constant dense<0.000000e+00> : vector<8xf32>
    %36 = vector.multi_reduction <add>, %35, %cst_28 [1] : vector<8x8xf32> to vector<8xf32>
    %37 = vector.shape_cast %36 : vector<8xf32> to vector<8x1xf32>
    %38 = tpu.reciprocal %37 {approx = true} : vector<8x1xf32> -> vector<8x1xf32>
    %39 = vector.broadcast %38 : vector<8x1xf32> to vector<8x8xf32>
    %40 = arith.mulf %35, %39 : vector<8x8xf32>
    %41 = arith.truncf %40 : vector<8x8xf32> to vector<8x8xbf16>
    %42 = arith.truncf %27 : vector<8x8xf32> to vector<8x8xbf16>
    %cst_29 = arith.constant dense<0.000000e+00> : vector<8x8xf32>
    %43 = tpu.matmul %41, %42, %cst_29 {dimension_numbers = #tpu.dot_dimension_numbers<[1], [0], [0], [1], [0, 0, 1, 1], [], []>} : vector<8x8xbf16>, vector<8x8xbf16>, vector<8x8xf32> -> vector<8x8xf32>
    %c0_30 = arith.constant 0 : index
    %c0_31 = arith.constant 0 : index
    %44 = vector.load %arg14[%c0_30, %c0_31] : memref<8x32xf32, #tpu.memory_space<vmem>>, vector<8x32xf32>
    %45 = arith.truncf %43 : vector<8x8xf32> to vector<8x8xbf16>
    %c0_32 = arith.constant 0 : index
    %c0_33 = arith.constant 0 : index
    %c0_34 = arith.constant 0 : index
    %46 = vector.load %arg11[%c0_32, %c0_33, %c0_34] : memref<1x8x32xbf16, #tpu.memory_space<vmem>>, vector<1x8x32xbf16>
    %47 = vector.shape_cast %46 : vector<1x8x32xbf16> to vector<8x32xbf16>
    %cst_35 = arith.constant dense<0.000000e+00> : vector<8x32xf32>
    %48 = tpu.matmul %45, %47, %cst_35 {dimension_numbers = #tpu.dot_dimension_numbers<[1], [0], [0], [1], [0, 0, 1, 1], [], []>} : vector<8x8xbf16>, vector<8x32xbf16>, vector<8x32xf32> -> vector<8x32xf32>
    %49 = arith.addf %44, %48 : vector<8x32xf32>
    %c0_36 = arith.constant 0 : index
    %c0_37 = arith.constant 0 : index
    %50 = vector.load %arg14[%c0_36, %c0_37] : memref<8x32xf32, #tpu.memory_space<vmem>>, vector<8x32xf32>
    tpu.vector_store %arg14[%c0_36, %c0_37], %49 {strides = array<i32>} : memref<8x32xf32, #tpu.memory_space<vmem>>, vector<8x32xf32>,
    %c3_i32 = arith.constant 3 : i32
    %51 = arith.cmpi eq, %arg2, %c3_i32 : i32
    %52 = arith.extui %51 : i1 to i32
    %c0_i32_38 = arith.constant 0 : i32
    %53 = arith.cmpi ne, %52, %c0_i32_38 : i32
    scf.if %53 {
      %c0_39 = arith.constant 0 : index
      %c0_40 = arith.constant 0 : index
      %54 = vector.load %arg14[%c0_39, %c0_40] : memref<8x32xf32, #tpu.memory_space<vmem>>, vector<8x32xf32>
      %c0_41 = arith.constant 0 : index
      %c0_42 = arith.constant 0 : index
      %55 = vector.load %arg12[%c0_41, %c0_42] : memref<1x32xf32, #tpu.memory_space<vmem>>, vector<1x32xf32>
      %56 = vector.broadcast %55 : vector<1x32xf32> to vector<8x32xf32>
      %57 = arith.addf %54, %56 : vector<8x32xf32>
      %c0_43 = arith.constant 0 : index
      %c0_44 = arith.constant 0 : index
      %c0_45 = arith.constant 0 : index
      %58 = vector.load %arg13[%c0_43, %c0_44, %c0_45] : memref<1x8x32xf32, #tpu.memory_space<vmem>>, vector<1x8x32xf32>
      %59 = vector.shape_cast %58 : vector<1x8x32xf32> to vector<8x32xf32>
      %60 = vector.shape_cast %57 : vector<8x32xf32> to vector<1x8x32xf32>
      tpu.vector_store %arg13[%c0_43, %c0_44, %c0_45], %60 {strides = array<i32>} : memref<1x8x32xf32, #tpu.memory_space<vmem>>, vector<1x8x32xf32>,
    } else {
    }
    return
  }
  func.func @transform_0(%arg0: i32, %arg1: i32, %arg2: i32) -> (i32, i32, i32) {
    %c0_i32 = arith.constant 0 : i32
    %c0_i32_0 = arith.constant 0 : i32
    return %arg0, %arg1, %c0_i32 : i32, i32, i32
  }
  func.func @transform_1(%arg0: i32, %arg1: i32, %arg2: i32) -> (i32, i32, i32) {
    %c0_i32 = arith.constant 0 : i32
    %c0_i32_0 = arith.constant 0 : i32
    %c0_i32_1 = arith.constant 0 : i32
    return %arg0, %c0_i32, %c0_i32_0 : i32, i32, i32
  }
  func.func @transform_2(%arg0: i32, %arg1: i32, %arg2: i32) -> (i32, i32, i32) {
    %c0_i32 = arith.constant 0 : i32
    %c0_i32_0 = arith.constant 0 : i32
    %c0_i32_1 = arith.constant 0 : i32
    return %arg2, %c0_i32, %c0_i32_0 : i32, i32, i32
  }
  func.func @transform_3(%arg0: i32, %arg1: i32, %arg2: i32) -> (i32, i32, i32) {
    %c0_i32 = arith.constant 0 : i32
    %c0_i32_0 = arith.constant 0 : i32
    %c0_i32_1 = arith.constant 0 : i32
    return %arg2, %c0_i32, %c0_i32_0 : i32, i32, i32
  }
  func.func @transform_4(%arg0: i32, %arg1: i32, %arg2: i32) -> (i32, i32, i32) {
    %c0_i32 = arith.constant 0 : i32
    %c0_i32_0 = arith.constant 0 : i32
    %c0_i32_1 = arith.constant 0 : i32
    return %arg2, %c0_i32, %c0_i32_0 : i32, i32, i32
  }
  func.func @transform_5(%arg0: i32, %arg1: i32, %arg2: i32) -> (i32, i32, i32) {
    %c0_i32 = arith.constant 0 : i32
    %c0_i32_0 = arith.constant 0 : i32
    %c0_i32_1 = arith.constant 0 : i32
    return %arg2, %c0_i32, %c0_i32_0 : i32, i32, i32
  }
  func.func @transform_6(%arg0: i32, %arg1: i32, %arg2: i32) -> (i32, i32, i32) {
    %c0_i32 = arith.constant 0 : i32
    %c0_i32_0 = arith.constant 0 : i32
    %c0_i32_1 = arith.constant 0 : i32
    return %arg2, %c0_i32, %c0_i32_0 : i32, i32, i32
  }
  func.func @transform_7(%arg0: i32, %arg1: i32, %arg2: i32) -> (i32, i32, i32) {
    %c0_i32 = arith.constant 0 : i32
    %c0_i32_0 = arith.constant 0 : i32
    %c0_i32_1 = arith.constant 0 : i32
    return %arg2, %c0_i32, %c0_i32_0 : i32, i32, i32
  }
  func.func @transform_8(%arg0: i32, %arg1: i32, %arg2: i32) -> (i32, i32, i32) {
    %c0_i32 = arith.constant 0 : i32
    %c0_i32_0 = arith.constant 0 : i32
    %c0_i32_1 = arith.constant 0 : i32
    return %arg2, %c0_i32, %c0_i32_0 : i32, i32, i32
  }
  func.func @transform_9(%arg0: i32, %arg1: i32, %arg2: i32) -> (i32, i32) {
    %c0_i32 = arith.constant 0 : i32
    %c0_i32_0 = arith.constant 0 : i32
    %c0_i32_1 = arith.constant 0 : i32
    return %c0_i32, %c0_i32_0 : i32, i32
  }
  func.func @transform_10(%arg0: i32, %arg1: i32, %arg2: i32) -> (i32, i32, i32) {
    %c0_i32 = arith.constant 0 : i32
    %c0_i32_0 = arith.constant 0 : i32
    return %arg0, %arg1, %c0_i32 : i32, i32, i32
  }
}

</mosaic_0001>

<bundles_post_ra>
// kernel: tpu_custom_call.1
= control target key start
LH: loop header
LB: loop body
LE: loop exit
PB: predicated region body
PF: predicated region fallthrough
CT: control target
= control target key end

     0   :  { %s1637_s0 = inlined_call_operand.vmem [shape: bf16[2,8,32], index: 0, kind: input, shape index: {}]   ;;  %s1638_s1 = inlined_call_operand.vmem [shape: bf16[2,8,32], index: 1, kind: input, shape index: {}]   ;;  %s1639_s2 = inlined_call_operand.vmem [shape: bf16[4,32,8], index: 2, kind: input, shape index: {}]   ;;  %s1640_s3 = inlined_call_operand.vmem [shape: f32[4,1,8], index: 3, kind: input, shape index: {}]   ;;  %s1641_s4 = inlined_call_operand.vmem [shape: bf16[4,32,8], index: 4, kind: input, shape index: {}]   ;;  %s1642_s5 = inlined_call_operand.vmem [shape: f32[4,1,8], index: 5, kind: input, shape index: {}]   ;;  %s1643_s6 = inlined_call_operand.vmem [shape: bf16[4,32,8], index: 6, kind: input, shape index: {}]   ;;  %s1644_s7 = inlined_call_operand.vmem [shape: f32[4,1,8], index: 7, kind: input, shape index: {}]   ;;  %s1645_s8 = inlined_call_operand.vmem [shape: bf16[4,8,32], index: 8, kind: input, shape index: {}]   ;;  %s1646_s9 = inlined_call_operand.vmem [shape: f32[1,32], index: 9, kind: input, shape index: {}]   ;;  %s1647_s10 = inlined_call_operand.hbm [shape: f32[2,8,32], index: 10, kind: output, shape index: {}]  }
   0x1   :  { %1661 = sst [smem:[#allocation17_spill]] %s1637_s0 }
   0x2   :  { %1662 = sst [smem:[#allocation18_spill]] %s1638_s1 }
   0x3   :  { %1663 = sst [smem:[#allocation19_spill]] %s1639_s2 }
   0x4   :  { %1664 = sst [smem:[#allocation20_spill]] %s1647_s10 }
   0x5   :  { %15 = vsyncpa [#allocation4], 0 }
   0x6   :  { %17 = vsyncpa [#allocation4 + $0x1], 0  ;;  %s1417_s13 = smov 0   ;;  %s1419_s14 = smov 0  }
   0x7   :  { %s1421_s15 = smov 0   ;;  %s1423_s16 = smov 0  }
   0x8   :  { %s1425_s17 = smov 0   ;;  %s1427_s18 = smov 0  }
   0x9   :  { %s1429_s19 = smov 0   ;;  %s1431_s20 = smov 0  }
   0xa LB: > { %1665 = sst [smem:[#allocation6_spill]] %s1328_s13  ;;  %s1081_s21 = sadd.s32 4294967295, %s1356_s20   ;;  %s1356_s20 = sphi %s1431_s20, %s23_s20   ;;  %s1352_s19 = sphi %s1429_s19, %s1696_s19   ;;  %s1348_s18 = sphi %s1427_s18, %s1695_s18   ;;  %s1344_s17 = sphi %s1425_s17, %s1694_s17   ;;  %s1340_s16 = sphi %s1423_s16, %s1693_s16   ;;  %s1336_s15 = sphi %s1421_s15, %s1692_s15   ;;  %s1332_s14 = sphi %s1419_s14, %s1691_s14   ;;  %s1328_s13 = sphi %s1417_s13, %s1690_s13  }
   0xb   : > { %1666 = sst [smem:[#allocation7_spill]] %s1332_s14  ;;  %s1082_s22 = sadd.s32 4294967294, %s1356_s20  }
   0xc   : > { %1667 = sst [smem:[#allocation8_spill]] %s1336_s15  ;;  %s35_s23 = sadd.s32 1, %s1348_s18 }
   0xd   : > { %1668 = sst [smem:[#allocation9_spill]] %s1348_s18  ;;  %p36_p0 = scmp.ge.s32.totalorder %s35_s23, 4 }
   0xe   : > { %1669 = sst [smem:[#allocation10_spill]] %s1352_s19  ;;  %s42_s24 = sadd.s32 1, %s1352_s19 }
   0xf   : > { %1670 = sst [smem:[#allocation11_spill]] %s1356_s20  ;;  %p318_p1 = scmp.ne.s32.totalorder %s1336_s15, %s1332_s14 }
  0x10   : > { %p319_p2 = scmp.eq.s32.totalorder %s1081_s21, 7  ;;  %s1698_s23 = smov (%p36_p0, %s35_s23), 0 }
  0x11   : > { %1671 = sst [smem:[#allocation12_spill]] %s1698_s23  ;;  %s1700_s24 = smov (!%p36_p0, %s42_s24), %s1352_s19 }
  0x12   : > { %p1466_p3 = por %p319_p2, %p318_p1  ;;  %p324_p4 = scmp.ne.s32.totalorder %s1332_s14, %s1328_s13 }
  0x13   : > { %p44_p5 = scmp.ge.s32.totalorder %s1700_s24, 2  ;;  %p325_p6 = scmp.eq.s32.totalorder %s1082_s22, 7 }
  0x14   : > { %s1672_s25 = scalar_select %p1466_p3, 1, 0 }
  0x15   : > { %p1085_p7 = scmp.ge.s32.totalorder %s1356_s20, 1  ;;  %p412_p8 = scmp.lt.s32.totalorder %s1356_s20, 9 }
  0x16   : > { %1673 = sst [smem:[#allocation13_spill]] %s1672_s25  ;;  %s1702_s24 = smov (%p44_p5, %s1700_s24), 0 }
  0x17   : > { %1674 = sst [smem:[#allocation14_spill]] %s1702_s24  ;;  %p1476_p9 = por %p325_p6, %p324_p4 }
  0x18   : > { %p413_p10 = pnand %p1085_p7, %p412_p8  ;;  %s303_s27 = ssub.s32 %s1352_s19, %s1702_s24 }
  0x19   : > { %s1675_s26 = scalar_select %p1476_p9, 1, 0 }
  0x1a   : > { %s308_s28 = sadd.s32 1, %s1336_s15  ;;  %p306_p11 = scmp.eq.s32.totalorder %s303_s27, 0 }
  0x1b   : > { %1676 = sst [smem:[#allocation15_spill]] %s1675_s26  ;;  %416 = sbr.rel (%p413_p10) target bundleno = 1269 (0x4f5), region = 60 }
  0x1c   : > { %s1484_s29 = scalar_select %p306_p11, %s1336_s15, %s308_s28  }
  0x1d   : > { %s1650_s30 = sand.u32 (!%p413_p10), 1, %s1332_s14   ;;  %p484_p12 = scmp.lt.s32.totalorder (!%p413_p10), %s1344_s17, 1 }
  0x1e   : > { %1677 = sst [smem:[#allocation16_spill]] %s1484_s29  ;;  %s1490_s11 = sshll.u32 (!%p413_p10), %s1650_s30, 3 }
  0x1f   : > { %p495_p13 = scmp.lt.s32.totalorder (!%p413_p10), %s1340_s16, 3  ;;  %s1678_s0 = sld [smem:[#allocation17_spill]] (!%p413_p10) }
  0x20   : > { %s1679_s1 = sld [smem:[#allocation18_spill]] (!%p413_p10)  ;;  %s1680_s2 = sld [smem:[#allocation19_spill]] (!%p413_p10) }
  0x21   : > { %s483_s25 = scalar_lea.vmem (!%p413_p10), [#allocation3], %s1490_s11  ;;  %p1096_p0 = scmp.ne.s32.totalorder (!%p413_p10), %s1340_s16, 0 }
  0x22   : > { %s485_s12 = scalar_select %p484_p12, %s1344_s17, 1 }
  0x23   : > { %s1495_s21 = scalar_select %p495_p13, %s1340_s16, 3 }
  0x24   : > { %s1087_s22 = sshll.u32 %s485_s12, 2  ;;  %527 = sbr.rel (%p1096_p0) target bundleno = 43 (0x2b), region = 64  ;;  %vm528_vm0 = vcmask (!%p1096_p0), 261120   ;;  %v1358_v0 = vmov (!%p1096_p0), 0.0  }
  0x25   : > { %s1500_s24 = scalar_lea.vmem %s1678_s0, %s1087_s22  ;;  %s1118_s18 = sshll.u32 %s1495_s21, 4  ;;  %529 = vst.msk [vmem:[#allocation2] sm:$0xff] (!%p1096_p0), %vm528_vm0, %v1358_v0 }
  0x26   : > { %s1505_s30 = scalar_lea.vmem %s1679_s1, %s1087_s22  ;;  %s499_s10 = scalar_lea.vmem %s1680_s2, %s1118_s18 }
  0x27   : > { %s507_s27 = scalar_lea.vmem %s1641_s4, %s1118_s18  ;;  %s510_s14 = scalar_lea.vmem %s1642_s5, %s1495_s21 }
  0x28   : > { %s1525_s22 = scalar_lea.vmem %s1643_s6, %s1118_s18  ;;  %s518_s29 = scalar_lea.vmem %s1644_s7, %s1495_s21 }
  0x29   : > { %s1095_s26 = sshll.u32 %s1495_s21, 2 }
  0x2a   : > { %s1535_s2 = scalar_lea.vmem %s1645_s8, %s1095_s26 }
  0x2b PF: > { %v1252_v1 = vld [vmem:[%s507_s27] sm:$0xff]   ;;  %v1359_v2 = vmov 0.0   ;;  %v1253_v3 = vld [vmem:[%s507_s27 + $0x8] sm:$0xff]   ;;  %vm1360_vm1 = vmmov 0   ;;  %vm555_vm2 = vcmask 261120   ;;  %vm730_vm3 = vcmask 64512  }
  0x2c   : > { %1144 = vmatprep.subr.bf16.mxu1 %v1359_v2  ;;  %1136 = vmatprep.subr.bf16.mxu0 %v1359_v2  ;;  %v1254_v4 = vld [vmem:[%s499_s10] sm:$0xff]   ;;  %v1255_v5 = vld [vmem:[%s499_s10 + $0x8] sm:$0xff]   ;;  %vm793_vm4 = vcmask 1043456   ;;  %p1112_p1 = scmp.ne.s32.totalorder %s1340_s16, 3 }
  0x2d   : > { %1145 = vmatpush3.bf16.msra.mxu1 %v1252_v1  ;;  %1148 = vmatprep.mubr.msk.bf16.mxu1 %vm1360_vm1, %v1359_v2  ;;  %v531_v6 = vld [vmem:[%s1505_s30] sm:$0xf]  ;;  %v1257_v24 = vld [vmem:[%s1525_s22 + $0x8] sm:$0xff]  }
  0x2e   : > { %1146 = vmatprep.subr.bf16.mxu1 %v1359_v2  ;;  %1140 = vmatprep.mubr.msk.bf16.mxu0 %vm1360_vm1, %v1359_v2  ;;  %v530_v7 = vld [vmem:[%s1500_s24] sm:$0xf]  ;;  %s1681_s24 = scalar_lea.vmem %s1640_s3, %s1495_s21 }
  0x2f   : > { %1137 = vmatpush3.bf16.msra.mxu0 %v1254_v4  ;;  %v1101_v8 = vld [vmem:[%s510_s14] ss:$0 sm:$0xff] }
  0x30   : > { %1138 = vmatprep.subr.bf16.mxu0 %v1359_v2  ;;  %v1097_v13 = vld [vmem:[%s1681_s24] ss:$0 sm:$0xff] }
  0x31   : > { %1147 = vmatpush3.bf16.msra.mxu1 %v1253_v3  ;;  %v1256_v23 = vld [vmem:[%s1525_s22] sm:$0xff]  }
  0x32   : > { %1160 = vmatprep.subr.bf16.mxu1 %v1359_v2  ;;  %v1105_v38 = vld [vmem:[%s518_s29] ss:$0 sm:$0xff] }
  0x33   : > { %1139 = vmatpush3.bf16.msra.mxu0 %v1255_v5  ;;  %v839_v43 = vld [vmem:[%s1535_s2] sm:$0xf] }
  0x34   : > { %1149 = vmatmul.mubr.msk.bf16.vlgmr.msra.gmra.mrb[0].mxu1 %vm555_vm2, %v531_v6  ;;  %1152 = vmatprep.subr.bf16.mxu0 %v1359_v2  ;;  %v844_v44 = vsel %vm793_vm4, %v839_v43, 0  ;;  %v837_v54 = vld [vmem:[#allocation2] sm:$0xff] }
  0x35   : > { %1162 = vmatprep.mubr.msk.bf16.mxu1 %vm1360_vm1, %v1359_v2  ;;  %v1113_v61 = vld [vmem:[%s1646_s9] ss:$0 sm:$0xff] (!%p1112_p1) }
  0x36   : > { %1141 = vmatmul.mubr.msk.bf16.vlgmr.msra.gmra.mrb[0].mxu0 %vm555_vm2, %v530_v7 }
  0x37   : > { %1156 = vmatprep.mubr.msk.bf16.mxu0 %vm1360_vm1, %v1359_v2  ;;  %1153 = vmatpush3.bf16.msra.mxu0 %v1256_v23 }
  0x38   : > { %1154 = vmatprep.subr.bf16.mxu0 %v1359_v2 }
  0x3b   : > { %1155 = vmatpush3.bf16.msra.mxu0 %v1257_v24 }
  0x3c   : > { %1166 = vmatprep.subr.bf16.mxu0 %v1359_v2 }
  0x3e   : > { %1157 = vmatmul.mubr.msk.bf16.vlgmr.msra.gmra.mrb[4].mxu0 %vm555_vm2, %v531_v6 }
  0x3f   : > { %1168 = vmatprep.mubr.msk.bf16.mxu0 %vm1360_vm1, %v1359_v2 }
 0x107   : > { %v659_v9 = vpop.f32.mrb[0].mxu1 }
 0x108   : > { %v660_v10 = vadd.f32 %v1101_v8, %v659_v9  ;;  %v1150_v11 = vpop.f32.mrb[1].mxu1 }
 0x109   : > { %v662_v12 = vpop.f32.mrb[2].mxu1  ;;  %v593_v14 = vpop.f32.mrb[0].mxu0 }
 0x10a   : > { %v729_v15 = vpack.c.bf16 %v660_v10, %v660_v10  ;;  %v1151_v16 = vpop.f32.mrb[3].mxu1  ;;  %v1142_v17 = vpop.f32.mrb[1].mxu0  ;;  %v594_v20 = vadd.f32 %v1097_v13, %v593_v14 }
 0x10b   : > { %v596_v18 = vpop.f32.mrb[2].mxu0 }
 0x10c   : > { %v735_v19 = vsel %vm730_vm3, %v729_v15, 0  ;;  %v1143_v21 = vpop.f32.mrb[3].mxu0  ;;  %v728_v22 = vpack.c.bf16 %v594_v20, %v594_v20 }
 0x10d   : > { %1161 = vmatpush3.bf16.xpose.msra.mxu1 %v735_v19 }
 0x10e   : > { %1172 = vmatprep.subr.bf16.mxu1 %v1359_v2 }
 0x111   : > { %v722_v35 = vpop.f32.mrb[4].mxu0 }
 0x112   : > { %v1158_v36 = vpop.f32.mrb[5].mxu0  ;;  %v723_v40 = vadd.f32 %v1105_v38, %v722_v35 }
 0x113   : > { %v725_v37 = vpop.f32.mrb[6].mxu0 }
 0x114   : > { %1163 = vmatmul.mubr.msk.bf16.vlgmr.msra.gmra.mrb[4].mxu1 %vm730_vm3, %v728_v22  ;;  %v1159_v39 = vpop.f32.mrb[7].mxu0  ;;  %v789_v41 = vpack.c.bf16 %v723_v40, %v723_v40 }
 0x115   : > { %1174 = vmatprep.mubr.msk.bf16.mxu1 %vm1360_vm1, %v1359_v2  ;;  %1173 = vmatpush3.bf16.msra.mxu1 %v844_v44 }
 0x116   : > { %v795_v42 = vsel %vm793_vm4, %v789_v41, 0 }
 0x117   : > { %1167 = vmatpush3.bf16.msra.mxu0 %v795_v42 }
 0x1e7   : > { %v771_v25 = vpop.f32.mrb[4].mxu1 }
 0x1e8   : > { %v1164_v26 = vpop.f32.mrb[5].mxu1  ;;  %v777_v27 = vsel %vm730_vm3, %v771_v25, -inf }
 0x1e9   : > { %778 = vmax.xlane.f32.xlu0 %v777_v27  ;;  %v774_v28 = vpop.f32.mrb[6].mxu1 }
 0x1ea   : > { %v1165_v29 = vpop.f32.mrb[7].mxu1 }
 0x276   : > { %v779_v30 = vpop.xlane.xlu0 %778 }
 0x277   : > { %v780_v31 = vsub.f32 %v771_v25, %v779_v30 }
 0x279   : > { %v781_v32 = vmul.f32 1.442695, %v780_v31 }
 0x27b   : > { %1258 = vpow2.f32 %v781_v32 }
 0x285   : > { %v1259_v33 = vpop.eup %1258 }
 0x286   : > { %v783_v34 = vsel %vm730_vm3, %v1259_v33, 0.0 }
 0x287   : > { %784 = vadd.xlane.f32.xlu0 %v783_v34 }
 0x314   : > { %v785_v45 = vpop.xlane.xlu0 %784 }
 0x315   : > { %1260 = vrcp.f32 %v785_v45 }
 0x31f   : > { %v1261_v46 = vpop.eup %1260 }
 0x320   : > { %v787_v47 = vmul.f32 %v1261_v46, %v1259_v33 }
 0x322   : > { %v788_v48 = vpack.c.bf16 %v787_v47, %v787_v47 }
 0x324   : > { %1169 = vmatmul.mubr.msk.bf16.vlgmr.msra.gmra.mrb[8].mxu0 %vm730_vm3, %v788_v48 }
 0x3f7   : > { %v831_v49 = vpop.f32.mrb[8].mxu0 }
 0x3f8   : > { %v838_v50 = vpack.c.bf16 %v831_v49, %v831_v49  ;;  %v1170_v51 = vpop.f32.mrb[9].mxu0 }
 0x3f9   : > { %v834_v52 = vpop.f32.mrb[10].mxu0 }
 0x3fa   : > { %v1171_v53 = vpop.f32.mrb[11].mxu0  ;;  %1175 = vmatmul.mubr.msk.bf16.vlgmr.msra.gmra.mrb[8].mxu1 %vm730_vm3, %v838_v50 }
 0x4ca   : > { %891 = sbr.rel (%p1112_p1) target bundleno = 1243 (0x4db), region = 68 }
 0x4cd   : > { %v880_v55 = vpop.f32.mrb[8].mxu1 }
 0x4ce   : > { %v886_v56 = vadd.f32 %v880_v55, %v837_v54  ;;  %v1176_v57 = vpop.f32.mrb[9].mxu1 }
 0x4cf   : > { %v883_v58 = vpop.f32.mrb[10].mxu1 }
 0x4d0   : > { %887 = vst.msk [vmem:[#allocation2] sm:$0xff] %vm555_vm2, %v886_v56  ;;  %v1177_v59 = vpop.f32.mrb[11].mxu1 }
 0x4d7   : > { %v892_v60 = vld [vmem:[#allocation2] sm:$0xff] }
 0x4d8   : > { %v900_v62 = vadd.f32 %v1113_v61, %v892_v60 }
 0x4da   : > { %901 = vst.msk [vmem:[%s483_s25] sm:$0xff] %vm555_vm2, %v900_v62 }
 0x4db PF: > { %s1682_s21 = sld [smem:[#allocation7_spill]]  ;;  %s1115_s27 = sshll.u32 %s1344_s17, 7 }
 0x4dc   : > { %s1684_s16 = sld [smem:[#allocation20_spill]]  ;;  %s917_s15 = sshll.u32 %s483_s25, 4  ;;  %s918_s15 = int_to_ptr.vmem [resolvable:$true] %s917_s15 }
 0x4dd   : > { %s1262_s20 = scalar_lea.vmem %s918_s15, 128  ;;  %s1361_s0 = smov [#allocation3]  }
 0x4de   : > { %p1263_p2 = scmp.ne.s32.totalorder %s918_s15, %s1262_s20  ;;  %s1266_s1 = sshll.u32 %s1361_s0, 4  ;;  %s1267_s1 = int_to_ptr.vmem [resolvable:$false] %s1266_s1 }
 0x4df   : > { %s1268_s10 = scalar_lea.vmem %s1267_s1, 256  ;;  %p1269_p6 = scmp.lt.s32.totalorder %s918_s15, %s1267_s1 }
 0x4e0   : > { %p1264_p4 = pnand %p1263_p2, %p1466_p3  ;;  %p1270_p7 = scmp.lt.s32.totalorder %s1268_s10, %s1262_s20 }
 0x4e1   : > { %s1686_s29 = sand.u32 1, %s1682_s21  }
 0x4e2   : > { %s1685_s23 = smov %s1684_s16  ;;  %s1586_s22 = scalar_lea.hbm %s1684_s16, %s1115_s27 }
 0x4e3   : > { %s903_s13 = scalar_lea.sflag [#allocation4], %s1686_s29  ;;  %p1265_p5 = pneg %p1264_p4 }
 0x4e4   : > { %p1271_p8 = por %p1270_p7, %p1269_p6 }
 0x4e6   : > { %p1272_p10 = pnand %p1271_p8, %p1265_p5 }
 0x4e8   : > { %1275 = shalt.err (!%p1272_p10)
}
 0x4e9   : > { %s1276_s17 = scalar_lea.hbm %s1586_s22, 128  ;;  %s1280_s18 = scalar_lea.hbm %s1685_s23, 256 }
 0x4ea   : > { %p1277_p11 = scmp.ne.s32.totalorder %s1586_s22, %s1276_s17  ;;  %p1281_p0 = scmp.lt.u32.totalorder %s1586_s22, %s1685_s23 }
 0x4eb   : > { %p1282_p1 = scmp.lt.u32.totalorder %s1280_s18, %s1276_s17  ;;  %p1284_p4 = scmp.lt.u32.totalorder %s1276_s17, %s1586_s22 }
 0x4ec   : > { %p1278_p12 = pnand %p1277_p11, %p1466_p3 }
 0x4ed   : > { %p1283_p2 = por %p1282_p1, %p1281_p0 }
 0x4ee   : > { %p1279_p13 = pneg %p1278_p12 }
 0x4ef   : > { %p1285_p5 = por %p1284_p4, %p1283_p2 }
 0x4f1   : > { %p1286_p6 = pnand %p1285_p5, %p1279_p13 }
 0x4f3   : > { %1289 = shalt.err (!%p1286_p6)
}
 0x4f4   : > { %1178 = dma.vmem_to_hbm [thread:$0]  (%p1466_p3), %s918_s15, 128, %s1586_s22, %s903_s13  }
 0x4f5 PF: > { %s1687_s26 = sld [smem:[#allocation11_spill]]  ;;  %s1688_s2 = sld [smem:[#allocation6_spill]] }
 0x4fb   : > { %p1184_p7 = scmp.ge.s32.totalorder %s1687_s26, 2  ;;  %s929_s21 = sand.u32 1, %s1688_s2  }
 0x4fc   : > { %s930_s27 = scalar_lea.sflag [#allocation4], %s929_s21 }
 0x4fd   : > { %p1181_p8 = pnand %p1184_p7, %p1476_p9 }
 0x4ff   : > { %1323 = dma.done.wait (!%p1181_p8), %s930_s27, 128  }
 0x500   : > { %1325 = vsyncadd (!%p1181_p8), %s930_s27, 4294967168  ;;  %s23_s20 = sadd.s32 1, %s1687_s26   ;;  %s1690_s13 = sld [smem:[#allocation7_spill]] }
 0x501   : > { %p20_p10 = scmp.ge.s32.totalorder %s23_s20, 10   ;;  %s1691_s14 = sld [smem:[#allocation8_spill]] }
 0x502   : > { %s1692_s15 = sld [smem:[#allocation16_spill]]  ;;  %s1693_s16 = sld [smem:[#allocation9_spill]] }
 0x503   : > { %s1694_s17 = sld [smem:[#allocation10_spill]]  ;;  %s1695_s18 = sld [smem:[#allocation12_spill]] }
 0x504   : > { %s1696_s19 = sld [smem:[#allocation14_spill]]  ;;  %22 = sbr.rel (!%p20_p10) target bundleno = 10 (0xa), region = 127 }
 0x50b   :  { %935 = vsyncpa [#allocation4], 1 }
 0x50c   :  { %937 = vsyncpa [#allocation4 + $0x1], 1 }

</bundles_post_ra>
